<compile_context>
chip_gen: v7x
topology: tpu7x:2x2x1
jax: 0.10.0
libtpu: 0.0.40
codegen_flags: <defaults>
</compile_context>

<pallas_src>
import functools

import jax
import jax.numpy as jnp
from jax.experimental import pallas as pl
from jax.experimental.pallas import tpu as pltpu


def _mlp_kernel(xt_ref, w1_ref, b1_ref, w2_ref, b2_ref, w3_ref, b3_ref, o_ref,
                *, mxu_dtype):
    xt = xt_ref[...]                                              # (2, tb)

    # ---- Layer 1 on the MXU: (64,2) @ (2,tb) -------------------------------
    h1 = jnp.dot(w1_ref[...].astype(mxu_dtype), xt.astype(mxu_dtype),
                 preferred_element_type=jnp.float32) + b1_ref[...]   # (64, tb)
    h1 = jnp.maximum(h1, 0.0)

    # ---- Layer 2 on the MXU: (32,64) @ (64,tb) -----------------------------
    h2 = jnp.dot(w2_ref[...].astype(mxu_dtype), h1.astype(mxu_dtype),
                 preferred_element_type=jnp.float32) + b2_ref[...]   # (32, tb)
    h2 = jnp.maximum(h2, 0.0)

    # ---- Layer 3 on the MXU: (1,32) @ (32,tb) ------------------------------
    out = jnp.dot(w3_ref[...].astype(mxu_dtype), h2.astype(mxu_dtype),
                  preferred_element_type=jnp.float32) + b3_ref[...]  # (1, tb)
    o_ref[...] = out.astype(o_ref.dtype)


def region_loss_regressor(x, params, *, tile_b=8192, use_bf16_mxu=False):
    """x: (N, 2) float32.  params: dict of weights/biases.  Returns (N, 1)."""
    w1, b1, w2, b2, w3, b3 = (params["w1"], params["b1"], params["w2"],
                              params["b2"], params["w3"], params["b3"])
    N, Fin = x.shape
    assert Fin == 2

    # Keep >= 2 grid steps for medium/large N (v7x megacore); multiple of 128.
    half = (pl.cdiv(N, 2) // 128) * 128
    tb = max(128, min(tile_b, half)) if half > 0 else 128
    assert tb % 128 == 0, "tile_b must be a multiple of 128 (lane width)"

    num_tiles = pl.cdiv(N, tb)
    n_pad = num_tiles * tb

    # Batch-on-lanes layout; pad the ragged tail tile only when needed.
    xt = x.T                                                      # (2, N)
    if n_pad != N:
        xt = jnp.pad(xt, ((0, 0), (0, n_pad - N)))

    mxu_dtype = jnp.bfloat16 if use_bf16_mxu else jnp.float32
    kernel = functools.partial(_mlp_kernel, mxu_dtype=mxu_dtype)

    def rep(shape):  # full-array block, same block every grid step
        return pl.BlockSpec(shape, lambda i: (0, 0))

    out_t = pl.pallas_call(
        kernel,
        out_shape=jax.ShapeDtypeStruct((1, n_pad), jnp.float32),
        grid_spec=pltpu.PrefetchScalarGridSpec(
            num_scalar_prefetch=0,
            grid=(num_tiles,),
            in_specs=[
                pl.BlockSpec((2, tb), lambda i: (0, i)),   # x^T tile
                rep((64, 2)),    # w1  (out, in)
                rep((64, 1)),    # b1  (out, 1)
                rep((32, 64)),   # w2
                rep((32, 1)),    # b2
                rep((1, 32)),    # w3  (out, in) PyTorch-style
                rep((1, 1)),     # b3
            ],
            out_specs=pl.BlockSpec((1, tb), lambda i: (0, i)),
        ),
        compiler_params=pltpu.CompilerParams(
            dimension_semantics=("parallel",)),
    )(xt, w1, b1, w2, b2, w3, b3)

    return out_t[:, :N].T                                         # (N, 1)


def init_params(key):
    """PyTorch nn.Linear default init U(-1/sqrt(in), 1/sqrt(in)).

    Weights are stored PyTorch-style (out_features, in_features); biases as
    (out_features, 1) columns so they broadcast over the lane (batch) axis.
    """
    ks = jax.random.split(key, 6)

    def lin(kw, kb, fin, fout):
        bound = 1.0 / jnp.sqrt(jnp.float32(fin))
        w = jax.random.uniform(kw, (fout, fin), jnp.float32, -bound, bound)
        b = jax.random.uniform(kb, (fout, 1), jnp.float32, -bound, bound)
        return w, b

    w1, b1 = lin(ks[0], ks[1], 2, 64)
    w2, b2 = lin(ks[2], ks[3], 64, 32)
    w3, b3 = lin(ks[4], ks[5], 32, 1)
    return dict(w1=w1, b1=b1, w2=w2, b2=b2, w3=w3, b3=b3)


def _reference(x, p):
    h1 = jnp.maximum(x @ p["w1"].T + p["b1"].T, 0.0)
    h2 = jnp.maximum(h1 @ p["w2"].T + p["b2"].T, 0.0)
    return h2 @ p["w3"].T + p["b3"].T


if __name__ == "__main__":
    key = jax.random.PRNGKey(0)
    k_params, k_x = jax.random.split(key)

    params = init_params(k_params)
    x = jax.random.normal(k_x, (8, 2), jnp.float32)    # (N=8, features=2)

    out = region_loss_regressor(x, params)             # exact f32 path
    out = jax.block_until_ready(out)

    ref = _reference(x, params)
    assert out.shape == (8, 1)
    assert jnp.allclose(out, ref, atol=1e-5, rtol=1e-5)

    print("KERNEL_OK")
</pallas_src>

<mosaic_0001>
module attributes {stable_mosaic.version = 11 : i64} {
  func.func @_mlp_kernel(%arg0: i32, %arg1: memref<2x128xf32, #tpu.memory_space<vmem>>, %arg2: memref<64x2xf32, #tpu.memory_space<vmem>>, %arg3: memref<64x1xf32, #tpu.memory_space<vmem>>, %arg4: memref<32x64xf32, #tpu.memory_space<vmem>>, %arg5: memref<32x1xf32, #tpu.memory_space<vmem>>, %arg6: memref<1x32xf32, #tpu.memory_space<vmem>>, %arg7: memref<1x1xf32, #tpu.memory_space<vmem>>, %arg8: memref<1x128xf32, #tpu.memory_space<vmem>>) attributes {dimension_semantics = [#tpu.dimension_semantics<parallel>], iteration_bounds = array<i64: 1>, scalar_prefetch = 0 : i64, scratch_operands = 0 : i64, tpu.core_type = #tpu.core_type<tc>, window_params = [{transform_indices = @transform_0, window_bounds = array<i64: 2, 128>}, {pipeline_mode = #tpu.pipeline_mode<synchronous>, transform_indices = @transform_1, window_bounds = array<i64: 64, 2>}, {pipeline_mode = #tpu.pipeline_mode<synchronous>, transform_indices = @transform_2, window_bounds = array<i64: 64, 1>}, {pipeline_mode = #tpu.pipeline_mode<synchronous>, transform_indices = @transform_3, window_bounds = array<i64: 32, 64>}, {pipeline_mode = #tpu.pipeline_mode<synchronous>, transform_indices = @transform_4, window_bounds = array<i64: 32, 1>}, {pipeline_mode = #tpu.pipeline_mode<synchronous>, transform_indices = @transform_5, window_bounds = array<i64: 1, 32>}, {pipeline_mode = #tpu.pipeline_mode<synchronous>, transform_indices = @transform_6, window_bounds = array<i64: 1, 1>}, {transform_indices = @transform_7, window_bounds = array<i64: 1, 128>}]} {
    %c0 = arith.constant 0 : index
    %c0_0 = arith.constant 0 : index
    %0 = vector.load %arg1[%c0, %c0_0] : memref<2x128xf32, #tpu.memory_space<vmem>>, vector<2x128xf32>
    %c0_1 = arith.constant 0 : index
    %c0_2 = arith.constant 0 : index
    %1 = vector.load %arg2[%c0_1, %c0_2] : memref<64x2xf32, #tpu.memory_space<vmem>>, vector<64x2xf32>
    %cst = arith.constant dense<0.000000e+00> : vector<64x128xf32>
    %2 = tpu.matmul %1, %0, %cst {dimension_numbers = #tpu.dot_dimension_numbers<[1], [0], [0], [1], [0, 0, 1, 1], [], []>} : vector<64x2xf32>, vector<2x128xf32>, vector<64x128xf32> -> vector<64x128xf32>
    %c0_3 = arith.constant 0 : index
    %c0_4 = arith.constant 0 : index
    %3 = vector.load %arg3[%c0_3, %c0_4] : memref<64x1xf32, #tpu.memory_space<vmem>>, vector<64x1xf32>
    %4 = vector.broadcast %3 : vector<64x1xf32> to vector<64x128xf32>
    %5 = arith.addf %2, %4 : vector<64x128xf32>
    %cst_5 = arith.constant 0.000000e+00 : f32
    %6 = vector.broadcast %cst_5 : f32 to vector<64x128xf32>
    %7 = arith.maximumf %5, %6 : vector<64x128xf32>
    %c0_6 = arith.constant 0 : index
    %c0_7 = arith.constant 0 : index
    %8 = vector.load %arg4[%c0_6, %c0_7] : memref<32x64xf32, #tpu.memory_space<vmem>>, vector<32x64xf32>
    %cst_8 = arith.constant dense<0.000000e+00> : vector<32x128xf32>
    %9 = tpu.matmul %8, %7, %cst_8 {dimension_numbers = #tpu.dot_dimension_numbers<[1], [0], [0], [1], [0, 0, 1, 1], [], []>} : vector<32x64xf32>, vector<64x128xf32>, vector<32x128xf32> -> vector<32x128xf32>
    %c0_9 = arith.constant 0 : index
    %c0_10 = arith.constant 0 : index
    %10 = vector.load %arg5[%c0_9, %c0_10] : memref<32x1xf32, #tpu.memory_space<vmem>>, vector<32x1xf32>
    %11 = vector.broadcast %10 : vector<32x1xf32> to vector<32x128xf32>
    %12 = arith.addf %9, %11 : vector<32x128xf32>
    %cst_11 = arith.constant 0.000000e+00 : f32
    %13 = vector.broadcast %cst_11 : f32 to vector<32x128xf32>
    %14 = arith.maximumf %12, %13 : vector<32x128xf32>
    %c0_12 = arith.constant 0 : index
    %c0_13 = arith.constant 0 : index
    %15 = vector.load %arg6[%c0_12, %c0_13] : memref<1x32xf32, #tpu.memory_space<vmem>>, vector<1x32xf32>
    %cst_14 = arith.constant dense<0.000000e+00> : vector<1x128xf32>
    %16 = tpu.matmul %15, %14, %cst_14 {dimension_numbers = #tpu.dot_dimension_numbers<[1], [0], [0], [1], [0, 0, 1, 1], [], []>} : vector<1x32xf32>, vector<32x128xf32>, vector<1x128xf32> -> vector<1x128xf32>
    %c0_15 = arith.constant 0 : index
    %c0_16 = arith.constant 0 : index
    %17 = vector.load %arg7[%c0_15, %c0_16] : memref<1x1xf32, #tpu.memory_space<vmem>>, vector<1x1xf32>
    %18 = vector.broadcast %17 : vector<1x1xf32> to vector<1x128xf32>
    %19 = arith.addf %16, %18 : vector<1x128xf32>
    %c0_17 = arith.constant 0 : index
    %c0_18 = arith.constant 0 : index
    %20 = vector.load %arg8[%c0_17, %c0_18] : memref<1x128xf32, #tpu.memory_space<vmem>>, vector<1x128xf32>
    tpu.vector_store %arg8[%c0_17, %c0_18], %19 {strides = array<i32>} : memref<1x128xf32, #tpu.memory_space<vmem>>, vector<1x128xf32>,
    return
  }
  func.func @transform_0(%arg0: i32) -> (i32, i32) {
    %c0_i32 = arith.constant 0 : i32
    %c0_i32_0 = arith.constant 0 : i32
    return %c0_i32, %arg0 : i32, i32
  }
  func.func @transform_1(%arg0: i32) -> (i32, i32) {
    %c0_i32 = arith.constant 0 : i32
    %c0_i32_0 = arith.constant 0 : i32
    %c0_i32_1 = arith.constant 0 : i32
    return %c0_i32, %c0_i32_0 : i32, i32
  }
  func.func @transform_2(%arg0: i32) -> (i32, i32) {
    %c0_i32 = arith.constant 0 : i32
    %c0_i32_0 = arith.constant 0 : i32
    %c0_i32_1 = arith.constant 0 : i32
    return %c0_i32, %c0_i32_0 : i32, i32
  }
  func.func @transform_3(%arg0: i32) -> (i32, i32) {
    %c0_i32 = arith.constant 0 : i32
    %c0_i32_0 = arith.constant 0 : i32
    %c0_i32_1 = arith.constant 0 : i32
    return %c0_i32, %c0_i32_0 : i32, i32
  }
  func.func @transform_4(%arg0: i32) -> (i32, i32) {
    %c0_i32 = arith.constant 0 : i32
    %c0_i32_0 = arith.constant 0 : i32
    %c0_i32_1 = arith.constant 0 : i32
    return %c0_i32, %c0_i32_0 : i32, i32
  }
  func.func @transform_5(%arg0: i32) -> (i32, i32) {
    %c0_i32 = arith.constant 0 : i32
    %c0_i32_0 = arith.constant 0 : i32
    %c0_i32_1 = arith.constant 0 : i32
    return %c0_i32, %c0_i32_0 : i32, i32
  }
  func.func @transform_6(%arg0: i32) -> (i32, i32) {
    %c0_i32 = arith.constant 0 : i32
    %c0_i32_0 = arith.constant 0 : i32
    %c0_i32_1 = arith.constant 0 : i32
    return %c0_i32, %c0_i32_0 : i32, i32
  }
  func.func @transform_7(%arg0: i32) -> (i32, i32) {
    %c0_i32 = arith.constant 0 : i32
    %c0_i32_0 = arith.constant 0 : i32
    return %c0_i32, %arg0 : i32, i32
  }
}

</mosaic_0001>

<bundles_post_ra>
// kernel: tpu_custom_call.1
= control target key start
LH: loop header
LB: loop body
LE: loop exit
PB: predicated region body
PF: predicated region fallthrough
CT: control target
= control target key end

     0   :  { %s748_s0 = inlined_call_operand.vmem [shape: f32[2,128], index: 0, kind: input, shape index: {}]   ;;  %s749_s1 = inlined_call_operand.vmem [shape: f32[64,2], index: 1, kind: input, shape index: {}]   ;;  %s750_s2 = inlined_call_operand.vmem [shape: f32[64,1], index: 2, kind: input, shape index: {}]   ;;  %s751_s3 = inlined_call_operand.vmem [shape: f32[32,64], index: 3, kind: input, shape index: {}]   ;;  %s752_s4 = inlined_call_operand.vmem [shape: f32[32,1], index: 4, kind: input, shape index: {}]   ;;  %s753_s5 = inlined_call_operand.vmem [shape: f32[1,32], index: 5, kind: input, shape index: {}]   ;;  %s754_s6 = inlined_call_operand.<no memory space> [shape: f32[1,1], index: 6, kind: input, shape index: {}]   ;;  %s755_s7 = inlined_call_operand.hbm [shape: f32[1,128], index: 7, kind: output, shape index: {}]  }
   0x1   :  { %v12_v0 = vstv %s754_s6 }
   0x2   :  { %13 = vst [vmem:[#allocation2] sm:$0x1] %v12_v0 }
   0x3   :  { %v29_v1 = vld [vmem:[%s748_s0] sm:$0x3]  ;;  %vm111_vm0 = vcmask 1041408   ;;  %vm86_vm1 = vcmask 15360   ;;  %v31_v3 = vld [vmem:[%s749_s1 + $0x8] sm:$0xff]  ;;  %v32_v4 = vld [vmem:[%s749_s1 + $0x10] sm:$0xff] }
   0x4   :  { %v30_v2 = vld [vmem:[%s749_s1] sm:$0xff]  ;;  %498 = vmatprep.subr.msk.mxu0 %vm111_vm0, %v29_v1  ;;  %v598_v5 = vmov 0   ;;  %v40_v7 = vld [vmem:[%s750_s2 + $0x10] sm:$0xff]  ;;  %v33_v8 = vld [vmem:[%s749_s1 + $0x18] sm:$0xff] }
   0x5   :  { %500 = vmatprep.mubr.msk.f32.mxu0 %vm86_vm1, %v30_v2  ;;  %499 = vmatpush3.msk.msra.mxu0 %vm111_vm0, %v29_v1  ;;  %v38_v6 = vld [vmem:[%s750_s2] sm:$0xff]  ;;  %v39_v10 = vld [vmem:[%s750_s2 + $0x8] sm:$0xff]  ;;  %v41_v11 = vld [vmem:[%s750_s2 + $0x18] sm:$0xff] }
   0x6   :  { %572 = vset.pattern.permute.xlu0 %v598_v5  ;;  %501 = vmatmul.mubr.msk.f32.vlgmr.msra.gmra.mrb[0].mxu0 %vm86_vm1, %v31_v3  ;;  %v34_v9 = vld [vmem:[%s749_s1 + $0x20] sm:$0xff] }
   0x7   :  { %573 = vset.pattern.permute.xlu1 %v598_v5  ;;  %503 = vmatprep.mubr.msk.f32.mxu0 %vm86_vm1, %v32_v4 }
   0x8   :  { %48 = vperm.xlu0 %572, %v38_v6   ;;  %58 = vperm.xlu1 %573, %v40_v7  }
   0xa   :  { %504 = vmatmul.mubr.msk.f32.gmra.mrb[2].mxu0 %vm86_vm1, %v33_v8 }
   0xb   :  { %14 = vsyncpa [#allocation4], 0  ;;  %506 = vmatprep.mubr.msk.f32.mxu0 %vm86_vm1, %v34_v9  ;;  %v35_v12 = vld [vmem:[%s749_s1 + $0x28] sm:$0xff]  ;;  %v36_v13 = vld [vmem:[%s749_s1 + $0x30] sm:$0xff]  ;;  %vm256_vm2 = vcmask 523264   ;;  %v599_v0 = vmov 0.0|0.0  }
   0xc   :  { %53 = vperm.xlu0 %572, %v39_v10   ;;  %v42_v14 = vld [vmem:[%s750_s2 + $0x20] sm:$0xff]  ;;  %63 = vperm.xlu1 %573, %v41_v11   ;;  %v43_v15 = vld [vmem:[%s750_s2 + $0x28] sm:$0xff]  ;;  %v37_v16 = vld [vmem:[%s749_s1 + $0x38] sm:$0xff]  ;;  %vm600_vm3 = vmmov 0   ;;  %v601_v1 = vmov 0.0   ;;  %vm369_vm4 = vcmask 261120  }
   0xd   :  { %v44_v17 = vld [vmem:[%s750_s2 + $0x30] sm:$0xff]  ;;  %v45_v18 = vld [vmem:[%s750_s2 + $0x38] sm:$0xff]  ;;  %v232_v19 = vld [vmem:[%s752_s4] sm:$0xff]  ;;  %561 = vmatprep.subr.bf16.mxu0 %v599_v0  ;;  %s602_s24 = smov [#allocation3]  }
   0xe   :  { %507 = vmatmul.mubr.msk.f32.gmra.mrb[4].mxu0 %vm86_vm1, %v35_v12  ;;  %v233_v20 = vld [vmem:[%s752_s4 + $0x8] sm:$0xff]  ;;  %v234_v21 = vld [vmem:[%s752_s4 + $0x10] sm:$0xff]  ;;  %v235_v22 = vld [vmem:[%s752_s4 + $0x18] sm:$0xff]  ;;  %s450_s25 = sshll.u32 %s602_s24, 4  ;;  %s451_s25 = int_to_ptr.vmem [resolvable:$true] %s450_s25 }
   0xf   :  { %509 = vmatprep.mubr.msk.f32.mxu0 %vm86_vm1, %v36_v13  ;;  %v359_v23 = vld [vmem:[#allocation2] sm:$0x1]  ;;  %v229_v61 = vld [vmem:[%s751_s3 + $0x8] sm:$0xff]  ;;  %v230_v62 = vld [vmem:[%s751_s3 + $0x10] sm:$0xff]  ;;  %s574_s26 = scalar_lea.vmem %s451_s25, 16  ;;  %s578_s27 = scalar_lea.vmem %s451_s25, 32 }
  0x10   :  { %68 = vperm.xlu0 %572, %v42_v14   ;;  %73 = vperm.xlu1 %573, %v43_v15   ;;  %v228_v24 = vld [vmem:[%s751_s3] sm:$0xff]  ;;  %v231_v63 = vld [vmem:[%s751_s3 + $0x18] sm:$0xff]  ;;  %p575_p0 = scmp.ne.s32.totalorder %s451_s25, %s574_s26  ;;  %p579_p1 = scmp.lt.s32.totalorder %s451_s25, %s451_s25 }
  0x11   :  { %528 = vmatprep.mubr.msk.f32.mxu1 %vm256_vm2, %v228_v24  ;;  %p580_p2 = scmp.lt.s32.totalorder %s578_s27, %s574_s26 }
  0x12   :  { %510 = vmatmul.mubr.msk.f32.gmra.mrb[6].mxu0 %vm86_vm1, %v37_v16 }
  0x13   :  { %542 = vmatprep.mubr.msk.f32.mxu0 %vm600_vm3, %v601_v1  ;;  %p581_p3 = por %p580_p2, %p579_p1 }
  0x14   :  { %78 = vperm.xlu0 %572, %v44_v17   ;;  %83 = vperm.xlu1 %573, %v45_v18  }
  0x15   :  { %p582_p4 = pnand %p581_p3, %p575_p0 }
  0x18   :  { %238 = vperm.xlu0 %572, %v232_v19   ;;  %243 = vperm.xlu1 %573, %v233_v20   ;;  %v358_v20 = vld [vmem:[%s753_s5] sm:$0x1] }
  0x1c   :  { %248 = vperm.xlu0 %572, %v234_v21   ;;  %253 = vperm.xlu1 %573, %v235_v22   ;;  %v365_v21 = vlaneseq }
  0x1e   :  { %v366_v22 = vshrl.u32 %v365_v21, 7 }
  0x20   :  { %362 = vperm.xlu0 %572, %v359_v23   ;;  %v367_v23 = vsub.s32 0, %v366_v22 }
  0x87   :  { %v49_v25 = vpop.permute.xlu0 %48  ;;  %v59_v26 = vpop.permute.xlu1 %58 }
  0x8b   :  { %v54_v27 = vpop.permute.xlu0 %53  ;;  %v64_v28 = vpop.permute.xlu1 %63 }
  0x8f   :  { %v74_v38 = vpop.permute.xlu1 %73  ;;  %v69_v41 = vpop.permute.xlu0 %68 }
  0x93   :  { %v84_v50 = vpop.permute.xlu1 %83  ;;  %v79_v53 = vpop.permute.xlu0 %78 }
  0x97   :  { %v244_v2 = vpop.permute.xlu1 %243  ;;  %v239_v3 = vpop.permute.xlu0 %238 }
  0x9b   :  { %v254_v9 = vpop.permute.xlu1 %253  ;;  %v249_v12 = vpop.permute.xlu0 %248 }
  0x9f   :  { %v363_v24 = vpop.permute.xlu0 %362 }
  0xd9   :  { %v502_v29 = vpop.f32.mrb[0].mxu0 }
  0xda   :  { %v187_v30 = vadd.f32 %v502_v29, %v54_v27  ;;  %v181_v31 = vpop.f32.mrb[1].mxu0 }
  0xdb   :  { %v182_v32 = vadd.f32 %v181_v31, %v49_v25  ;;  %v368_v25 = vrot.slane %v363_v24, %v367_v23 }
  0xdc   :  { %v221_v33 = vmax.f32 %v187_v30, 0.0 }
  0xdd   :  { %v220_v34 = vmax.f32 %v182_v32, 0.0  ;;  %v505_v35 = vpop.f32.mrb[2].mxu0 }
  0xde   :  { %v197_v36 = vadd.f32 %v505_v35, %v64_v28  ;;  %v191_v37 = vpop.f32.mrb[3].mxu0 }
  0xdf   :  { %v192_v39 = vadd.f32 %v191_v37, %v59_v26  ;;  %v545_v40 = vpack.c.bf16 %v221_v33, %v220_v34 }
  0xe0   :  { %v223_v42 = vmax.f32 %v197_v36, 0.0 }
  0xe1   :  { %v222_v43 = vmax.f32 %v192_v39, 0.0  ;;  %v508_v44 = vpop.f32.mrb[4].mxu0  ;;  %546 = vmatprep.subr.bf16.mxu1 %v545_v40 }
  0xe2   :  { %v207_v45 = vadd.f32 %v508_v44, %v74_v38  ;;  %v201_v46 = vpop.f32.mrb[5].mxu0  ;;  %548 = vmatpush3.bf16.msra.mxu1 %v545_v40 }
  0xe3   :  { %v549_v47 = vpack.c.bf16 %v223_v42, %v222_v43  ;;  %v202_v48 = vadd.f32 %v201_v46, %v69_v41 }
  0xe4   :  { %v225_v49 = vmax.f32 %v207_v45, 0.0 }
  0xe5   :  { %v224_v51 = vmax.f32 %v202_v48, 0.0  ;;  %v511_v52 = vpop.f32.mrb[6].mxu0  ;;  %550 = vmatprep.subr.bf16.mxu1 %v549_v47 }
  0xe6   :  { %v217_v54 = vadd.f32 %v511_v52, %v84_v50  ;;  %v211_v55 = vpop.f32.mrb[7].mxu0  ;;  %552 = vmatpush3.bf16.msra.mxu1 %v549_v47 }
  0xe7   :  { %v553_v56 = vpack.c.bf16 %v225_v49, %v224_v51  ;;  %v212_v57 = vadd.f32 %v211_v55, %v79_v53 }
  0xe8   :  { %v227_v58 = vmax.f32 %v217_v54, 0.0 }
  0xe9   :  { %v226_v59 = vmax.f32 %v212_v57, 0.0  ;;  %554 = vmatprep.subr.bf16.mxu1 %v553_v56 }
  0xea   :  { %556 = vmatpush3.bf16.msra.mxu1 %v553_v56 }
  0xeb   :  { %v557_v60 = vpack.c.bf16 %v227_v58, %v226_v59 }
  0xed   :  { %558 = vmatprep.subr.bf16.mxu1 %v557_v60 }
  0xee   :  { %560 = vmatpush3.bf16.msra.mxu1 %v557_v60 }
  0xf1   :  { %529 = vmatmul.mubr.msk.f32.vlgmr.msra.gmra.mrb[0].mxu1 %vm256_vm2, %v229_v61 }
  0xf2   :  { %531 = vmatprep.mubr.msk.f32.mxu1 %vm256_vm2, %v230_v62 }
  0xf5   :  { %532 = vmatmul.mubr.msk.f32.gmra.mrb[2].mxu1 %vm256_vm2, %v231_v63 }
 0x1c4   :  { %v530_v4 = vpop.f32.mrb[0].mxu1 }
 0x1c5   :  { %v341_v5 = vadd.f32 %v530_v4, %v244_v2  ;;  %v335_v6 = vpop.f32.mrb[1].mxu1 }
 0x1c6   :  { %v336_v7 = vadd.f32 %v335_v6, %v239_v3 }
 0x1c7   :  { %v355_v8 = vmax.f32 %v341_v5, 0.0 }
 0x1c8   :  { %v354_v10 = vmax.f32 %v336_v7, 0.0  ;;  %v533_v11 = vpop.f32.mrb[2].mxu1 }
 0x1c9   :  { %v351_v13 = vadd.f32 %v533_v11, %v254_v9  ;;  %v345_v14 = vpop.f32.mrb[3].mxu1 }
 0x1ca   :  { %v562_v15 = vpack.c.bf16 %v355_v8, %v354_v10  ;;  %v346_v16 = vadd.f32 %v345_v14, %v249_v12 }
 0x1cb   :  { %v357_v17 = vmax.f32 %v351_v13, 0.0 }
 0x1cc   :  { %v356_v18 = vmax.f32 %v346_v16, 0.0  ;;  %563 = vmatpush3.bf16.msra.mxu0 %v562_v15 }
 0x1cd   :  { %564 = vmatprep.subr.bf16.mxu0 %v599_v0 }
 0x1ce   :  { %v565_v19 = vpack.c.bf16 %v357_v17, %v356_v18 }
 0x1d0   :  { %566 = vmatpush3.bf16.msra.mxu0 %v565_v19 }
 0x1d3   :  { %543 = vmatmul.mubr.msk.f32.vlgmr.msra.gmra.mrb[8].mxu0 %vm369_vm4, %v358_v20 }
 0x2a6   :  { %v439_v26 = vpop.f32.mrb[8].mxu0 }
 0x2a7   :  { %v440_v27 = vadd.f32 %v439_v26, %v368_v25  ;;  %v544_v28 = vpop.f32.mrb[9].mxu0 }
 0x2a9   :  { %443 = vst [vmem:[#allocation3] sm:$0x1] %v440_v27 }
 0x2aa   :  { %585 = shalt.err (!%p582_p4)
}
 0x2ab   :  { %s586_s29 = scalar_lea.hbm %s755_s7, 16 }
 0x2ac   :  { %p587_p5 = scmp.ne.s32.totalorder %s755_s7, %s586_s29  ;;  %p590_p6 = scmp.lt.u32.totalorder %s586_s29, %s755_s7 }
 0x2ae   :  { %p592_p7 = pnand %p590_p6, %p587_p5 }
 0x2b0   :  { %595 = shalt.err (!%p592_p7)
}
 0x2b1   :  { %453 = dma.vmem_to_hbm [thread:$0]  %s451_s25, 16, %s755_s7, [#allocation4]  }
 0x2b2   :  { %596 = dma.done.wait [#allocation4], 16  }
 0x2b3   :  { %597 = vsyncadd [#allocation4], 4294967280 }
 0x2b4   :  { %457 = vsyncpa [#allocation4], 1 }

</bundles_post_ra>
